<compile_context>
chip_gen: v7x
topology: tpu7x:2x2x1
jax: 0.10.0
libtpu: 0.0.40
codegen_flags: <defaults>
</compile_context>

<pallas_src>
import jax
import jax.numpy as jnp
from jax.experimental import pallas as pl
from jax.experimental.pallas import tpu as pltpu

_MIB = 1024 * 1024


def _round_up(x, m):
    return (x + m - 1) // m * m


def _sublane_pack(itemsize):
    # Native VMEM tile is (8 * {1,2,4}, 128) for 4/2/1-byte dtypes.
    return max(8, 8 * (4 // max(1, itemsize)))


def _vmem_capacity_bytes():
    try:
        cap = getattr(pltpu.get_tpu_info(), "vmem_capacity_bytes", None)
        if cap:
            return int(cap)
    except Exception:
        pass
    return 128 * _MIB


def _buffer_budget_bytes(cap):
    # Target total bytes for all pipeline buffers (in + out, x2 buffers).
    if cap <= 64 * _MIB:          # v7x-class part (64 MiB physical VMEM).
        return 20 * _MIB
    return 48 * _MIB              # v5e / v6e (128 MiB physical VMEM).


def _spatial_tile_cap(tc, itemsize, budget, sub):
    # Padded bytes contributed per spatial row by (in + out) x 2 buffers.
    per_row = 2 * itemsize * (_round_up(tc, 128) + _round_up(tc, sub))
    return max(128, budget // per_row // 128 * 128)


def _choose_tiles(hw, c, itemsize, budget):
    """Pick (spatial tile ts, channel tile tc) from padded VMEM footprints."""
    sub = _sublane_pack(itemsize)
    tc = c
    ts_cap = _spatial_tile_cap(tc, itemsize, budget, sub)
    if hw > ts_cap and ts_cap < 512:
        # Very large C: tile channels so the spatial tile (output lane dim)
        # can stay a healthy multiple of 128.
        tc = budget // (2 * itemsize * 2 * 512) // 128 * 128
        tc = max(128, min(tc, _round_up(c, 128)))
        if tc >= c:
            tc = c
        ts_cap = _spatial_tile_cap(tc, itemsize, budget, sub)
    if hw <= ts_cap:
        return hw, tc
    ts = ts_cap
    # Prefer a 128-multiple that divides HW (no masked edge tile), as long as
    # it does not shrink the tile below ~half the cap.
    k_hi, k_lo = ts_cap // 128, max(1, ts_cap // 256)
    for k in range(k_hi, k_lo - 1, -1):
        if hw % (k * 128) == 0:
            ts = k * 128
            break
    return ts, tc


def _choose_batch_block(n, hw, c, itemsize, budget):
    """How many whole batches to pack per grid step (whole-image path)."""
    sub = _sublane_pack(itemsize)
    per_batch = itemsize * (_round_up(hw, sub) * _round_up(c, 128)
                            + _round_up(c, sub) * _round_up(hw, 128))
    nb = max(1, budget // (2 * per_batch))
    nb = min(nb, 8, n)
    if n > 1:
        # Keep >= 2 grid steps so both TensorCores on a dual-core part work.
        nb = min(nb, max(1, n // 2))
    while n % nb:
        nb -= 1
    return nb


def _transpose2d_kernel(x_ref, o_ref):
    # x_ref: (ts, tc) tile in VMEM;  o_ref: (tc, ts) tile in VMEM.
    o_ref[...] = x_ref[...].T


def _make_batched_kernel(nb):
    def kernel(x_ref, o_ref):
        # x_ref: (nb, HW, C);  o_ref: (nb, C, HW).  Static unroll of proven
        # 2D transposes amortizes per-grid-step overhead for small images.
        for b in range(nb):
            o_ref[b] = x_ref[b].T
    return kernel


def nhwc_to_nchw(x, vmem_budget_bytes=None):
    """Permute an NHWC tensor to NCHW with a Pallas TPU kernel."""
    n, h, w, c = x.shape
    hw = h * w
    itemsize = jnp.dtype(x.dtype).itemsize
    sub = _sublane_pack(itemsize)

    cap = _vmem_capacity_bytes()
    budget = vmem_budget_bytes if vmem_budget_bytes is not None else _buffer_budget_bytes(cap)

    ts, tc = _choose_tiles(hw, c, itemsize, budget)
    x2 = x.reshape(n, hw, c)                   # free view-style reshape in XLA
    out_shape = jax.ShapeDtypeStruct((n, c, hw), x.dtype)
    cost = pl.CostEstimate(flops=0, transcendentals=0,
                           bytes_accessed=2 * n * hw * c * itemsize)

    if tc == c and ts == hw:
        # Whole-image path: one (or several) full batches per grid step.
        nb = _choose_batch_block(n, hw, c, itemsize, budget)
        used = 2 * nb * itemsize * (_round_up(hw, sub) * _round_up(c, 128)
                                    + _round_up(c, sub) * _round_up(hw, 128))
        grid_spec = pltpu.PrefetchScalarGridSpec(
            num_scalar_prefetch=0,
            grid=(n // nb,),
            in_specs=[pl.BlockSpec((nb, hw, c), lambda i: (i, 0, 0))],
            out_specs=pl.BlockSpec((nb, c, hw), lambda i: (i, 0, 0)),
        )
        kernel = _make_batched_kernel(nb)
        dims = ("parallel",)
    else:
        # Tiled path: spatial (and possibly channel) tiles.
        n_c = pl.cdiv(c, tc)
        n_s = pl.cdiv(hw, ts)
        used = 2 * itemsize * (_round_up(ts, sub) * _round_up(tc, 128)
                               + _round_up(tc, sub) * _round_up(ts, 128))
        grid_spec = pltpu.PrefetchScalarGridSpec(
            num_scalar_prefetch=0,
            grid=(n, n_c, n_s),
            in_specs=[pl.BlockSpec((None, ts, tc), lambda b, ci, si: (b, si, ci))],
            out_specs=pl.BlockSpec((None, tc, ts), lambda b, ci, si: (b, ci, si)),
        )
        kernel = _transpose2d_kernel
        dims = ("parallel", "parallel", "parallel")

    # Scoped-VMEM limit sized to the actual padded buffer footprint so the
    # enlarged tiles fit the 16/32 MiB defaults on v5e/v6e/v7x.
    vmem_limit = min(max(32 * _MIB, int(used * 1.5) + 8 * _MIB), cap - 16 * _MIB)
    vmem_limit = max(vmem_limit, used + 8 * _MIB)

    out2 = pl.pallas_call(
        kernel,
        out_shape=out_shape,
        grid_spec=grid_spec,
        compiler_params=pltpu.CompilerParams(
            dimension_semantics=dims,
            vmem_limit_bytes=vmem_limit,
        ),
        # Pure data movement: 0 flops, read + write every element once.
        cost_estimate=cost,
    )(x2)

    return out2.reshape(n, c, h, w)


if __name__ == "__main__":
    key = jax.random.PRNGKey(0)
    k1, k2, k3, k4 = jax.random.split(key, 4)

    # Primary small test (module's typical NHWC use): N=2, 16x16 spatial, C=4.
    x = jax.random.normal(k1, (2, 16, 16, 4), dtype=jnp.float32)
    out = jax.block_until_ready(nhwc_to_nchw(x))
    ref = jnp.transpose(x, (0, 3, 1, 2))
    assert out.shape == ref.shape, out.shape
    assert out.dtype == x.dtype, out.dtype
    assert bool(jnp.array_equal(out, ref)), "mismatch (whole-image path)"

    # Whole-image path with a larger, non-trivial spatial extent.
    x2 = jax.random.normal(k2, (1, 48, 48, 8), dtype=jnp.float32)
    out2 = jax.block_until_ready(nhwc_to_nchw(x2))
    assert bool(jnp.array_equal(out2, jnp.transpose(x2, (0, 3, 1, 2)))), \
        "mismatch (whole-image path, HW=2304)"

    # Spatial-tiled path with a partial (masked) edge tile, forced by a small
    # budget override so it exercises the same code path on every generation.
    x3 = jax.random.normal(k3, (2, 24, 24, 16), dtype=jnp.float32)
    out3 = jax.block_until_ready(nhwc_to_nchw(x3, vmem_budget_bytes=128 * 1024))
    assert bool(jnp.array_equal(out3, jnp.transpose(x3, (0, 3, 1, 2)))), \
        "mismatch (spatial-tiled path)"

    # Channel + spatial tiled path with a partial channel edge tile.
    x4 = jax.random.normal(k4, (1, 16, 16, 300), dtype=jnp.float32)
    out4 = jax.block_until_ready(nhwc_to_nchw(x4, vmem_budget_bytes=64 * 1024))
    assert bool(jnp.array_equal(out4, jnp.transpose(x4, (0, 3, 1, 2)))), \
        "mismatch (channel-tiled path)"

    print("KERNEL_OK")
</pallas_src>

<mosaic_0001>
module attributes {stable_mosaic.version = 11 : i64} {
  func.func @kernel(%arg0: i32, %arg1: memref<1x256x4xf32, #tpu.memory_space<vmem>>, %arg2: memref<1x4x256xf32, #tpu.memory_space<vmem>>) attributes {dimension_semantics = [#tpu.dimension_semantics<parallel>], iteration_bounds = array<i64: 2>, scalar_prefetch = 0 : i64, scratch_operands = 0 : i64, tpu.core_type = #tpu.core_type<tc>, window_params = [{transform_indices = @transform_0, window_bounds = array<i64: 1, 256, 4>}, {transform_indices = @transform_1, window_bounds = array<i64: 1, 4, 256>}]} {
    %c0 = arith.constant 0 : index
    %c0_0 = arith.constant 0 : index
    %c0_1 = arith.constant 0 : index
    %0 = vector.load %arg1[%c0, %c0_0, %c0_1] : memref<1x256x4xf32, #tpu.memory_space<vmem>>, vector<1x256x4xf32>
    %1 = vector.shape_cast %0 : vector<1x256x4xf32> to vector<256x4xf32>
    %2 = tpu.transpose %1, [1, 0] : vector<256x4xf32> -> vector<4x256xf32>
    %c0_2 = arith.constant 0 : index
    %c0_3 = arith.constant 0 : index
    %c0_4 = arith.constant 0 : index
    %3 = vector.load %arg2[%c0_2, %c0_3, %c0_4] : memref<1x4x256xf32, #tpu.memory_space<vmem>>, vector<1x4x256xf32>
    %4 = vector.shape_cast %3 : vector<1x4x256xf32> to vector<4x256xf32>
    %5 = vector.shape_cast %2 : vector<4x256xf32> to vector<1x4x256xf32>
    tpu.vector_store %arg2[%c0_2, %c0_3, %c0_4], %5 {strides = array<i32>} : memref<1x4x256xf32, #tpu.memory_space<vmem>>, vector<1x4x256xf32>,
    return
  }
  func.func @transform_0(%arg0: i32) -> (i32, i32, i32) {
    %c0_i32 = arith.constant 0 : i32
    %c0_i32_0 = arith.constant 0 : i32
    %c0_i32_1 = arith.constant 0 : i32
    return %arg0, %c0_i32, %c0_i32_0 : i32, i32, i32
  }
  func.func @transform_1(%arg0: i32) -> (i32, i32, i32) {
    %c0_i32 = arith.constant 0 : i32
    %c0_i32_0 = arith.constant 0 : i32
    %c0_i32_1 = arith.constant 0 : i32
    return %arg0, %c0_i32, %c0_i32_0 : i32, i32, i32
  }
}

</mosaic_0001>

<bundles_post_ra>
// kernel: tpu_custom_call.1
= control target key start
LH: loop header
LB: loop body
LE: loop exit
PB: predicated region body
PF: predicated region fallthrough
CT: control target
= control target key end

     0   :  { %6 = vsyncpa [#allocation3], 0  ;;  %s552_s0 = inlined_call_operand.vmem [shape: f32[2,256,4], index: 0, kind: input, shape index: {}]   ;;  %s553_s1 = inlined_call_operand.hbm [shape: f32[2,4,256], index: 1, kind: output, shape index: {}]  }
   0x1   :  { %8 = vsyncpa [#allocation3 + $0x1], 0  ;;  %s418_s6 = smov 0   ;;  %s420_s7 = smov 0  }
   0x2   :  { %s422_s8 = smov 0   ;;  %s424_s9 = smov 0  }
   0x3 LB: > { %s439_s10 = sadd.s32 4294967295, %s405_s9   ;;  %s290_s11 = sadd.s32 4294967294, %s405_s9   ;;  %s405_s9 = sphi %s424_s9, %s559_s9   ;;  %s401_s8 = sphi %s422_s8, %s558_s8   ;;  %s397_s7 = sphi %s420_s7, %s557_s7   ;;  %s393_s6 = sphi %s418_s6, %s556_s6  }
   0x4   : > { %s443_s12 = sadd.s32 1, %s405_s9   ;;  %s47_s13 = sadd.s32 1, %s401_s8 }
   0x5   : > { %s44_s14 = ssub.s32 %s405_s9, %s443_s12  ;;  %p57_p0 = scmp.ne.s32.totalorder %s401_s8, %s397_s7 }
   0x6   : > { %p45_p1 = scmp.eq.s32.totalorder %s44_s14, 0  ;;  %p58_p2 = scmp.eq.s32.totalorder %s439_s10, 1 }
   0x7   : > { %p63_p3 = scmp.ne.s32.totalorder %s397_s7, %s393_s6  ;;  %p64_p4 = scmp.eq.s32.totalorder %s290_s11, 1 }
   0x8   : > { %s454_s15 = scalar_select %p45_p1, %s401_s8, %s47_s13  }
   0x9   : > { %p456_p5 = por %p58_p2, %p57_p0  ;;  %p460_p6 = por %p64_p4, %p63_p3 }
   0xa   : > { %p293_p7 = scmp.ge.s32.totalorder %s405_s9, 1  ;;  %p90_p8 = scmp.lt.s32.totalorder %s405_s9, 3 }
   0xc   : > { %p91_p9 = pnand %p293_p7, %p90_p8 }
   0xd   : > { %p110_p10 = scmp.lt.s32.totalorder (!%p91_p9), %s439_s10, 1  ;;  %s107_s23 = sand.u32 (!%p91_p9), 1, %s397_s7  }
   0xe   : > { %94 = sbr.rel (%p91_p9) target bundleno = 172 (0xac), region = 24  ;;  %s294_s24 = sshll.u32 (!%p91_p9), %s107_s23, 3 }
   0xf   : > { %s303_s25 = sshll.u32 (!%p91_p9), %s439_s10, 7  ;;  %s109_s26 = scalar_lea.vmem (!%p91_p9), [#allocation2], %s294_s24 }
  0x10   : > { %s231_s27 = sshll.u32 (!%p91_p9), %s109_s26, 4  ;;  %s510_s30 = scalar_lea.hbm (!%p91_p9), %s553_s1, %s303_s25  ;;  %s512_s27 = int_to_ptr.vmem [resolvable:$true] %s231_s27 }
  0x11   : > { %s217_s2 = scalar_lea.sflag (!%p91_p9), [#allocation3], %s107_s23  ;;  %s343_s3 = scalar_lea.vmem (!%p91_p9), %s512_s27, 128 }
  0x12   : > { %p344_p11 = scmp.ne.s32.totalorder (!%p91_p9), %s512_s27, %s343_s3  ;;  %s407_s4 = smov (!%p91_p9), [#allocation2]  }
  0x13   : > { %s347_s5 = sshll.u32 (!%p91_p9), %s407_s4, 4  ;;  %s348_s5 = int_to_ptr.vmem [resolvable:$false] %s347_s5 }
  0x14   : > { %p345_p12 = pnand (!%p91_p9), %p344_p11, %p456_p5  ;;  %p350_p0 = scmp.lt.s32.totalorder (!%p91_p9), %s512_s27, %s348_s5 }
  0x15   : > { %s111_s18 = scalar_select %p110_p10, %s439_s10, 1 }
  0x16   : > { %p346_p13 = pneg %p345_p12  ;;  %s349_s10 = scalar_lea.vmem %s348_s5, 256 }
  0x17   : > { %s302_s19 = sshll.u32 %s111_s18, 8  ;;  %p351_p1 = scmp.lt.s32.totalorder %s349_s10, %s343_s3 }
  0x18   : > { %s471_s22 = scalar_lea.vmem %s552_s0, %s302_s19 }
  0x19   : > { %v131_v0 = vld [vmem:[%s471_s22 + $0x80] sm:$0xff]  ;;  %v132_v2 = vld [vmem:[%s471_s22 + $0x88] sm:$0xff]  ;;  %v133_v4 = vld [vmem:[%s471_s22 + $0x90] sm:$0xff]  ;;  %p352_p2 = por %p351_p1, %p350_p0 }
  0x1a   : > { %v115_v1 = vld [vmem:[%s471_s22] sm:$0xff]  ;;  %179 = vxpose.xlu1.b32.start [1/16] (narrow) %v131_v0, 8  ;;  %v116_v3 = vld [vmem:[%s471_s22 + $0x8] sm:$0xff]  ;;  %v117_v5 = vld [vmem:[%s471_s22 + $0x10] sm:$0xff] }
  0x1b   : > { %147 = vxpose.xlu0.b32.start [1/16] (narrow) %v115_v1, 8  ;;  %v134_v6 = vld [vmem:[%s471_s22 + $0x98] sm:$0xff]  ;;  %v135_v8 = vld [vmem:[%s471_s22 + $0xa0] sm:$0xff]  ;;  %v136_v10 = vld [vmem:[%s471_s22 + $0xa8] sm:$0xff]  ;;  %p353_p3 = pnand %p352_p2, %p346_p13 }
  0x1c   : > { %v118_v7 = vld [vmem:[%s471_s22 + $0x18] sm:$0xff]  ;;  %v119_v9 = vld [vmem:[%s471_s22 + $0x20] sm:$0xff]  ;;  %v120_v11 = vld [vmem:[%s471_s22 + $0x28] sm:$0xff] }
  0x1d   : > { %v137_v12 = vld [vmem:[%s471_s22 + $0xb0] sm:$0xff]  ;;  %v138_v14 = vld [vmem:[%s471_s22 + $0xb8] sm:$0xff]  ;;  %v139_v16 = vld [vmem:[%s471_s22 + $0xc0] sm:$0xff] }
  0x1e   : > { %180 = vxpose.xlu1.b32.cont [2/16] (narrow) %v132_v2, 8  ;;  %v121_v13 = vld [vmem:[%s471_s22 + $0x30] sm:$0xff]  ;;  %v122_v15 = vld [vmem:[%s471_s22 + $0x38] sm:$0xff]  ;;  %v123_v17 = vld [vmem:[%s471_s22 + $0x40] sm:$0xff] }
  0x1f   : > { %148 = vxpose.xlu0.b32.cont [2/16] (narrow) %v116_v3, 8  ;;  %v140_v18 = vld [vmem:[%s471_s22 + $0xc8] sm:$0xff]  ;;  %v141_v20 = vld [vmem:[%s471_s22 + $0xd0] sm:$0xff]  ;;  %v142_v22 = vld [vmem:[%s471_s22 + $0xd8] sm:$0xff] }
  0x20   : > { %v124_v19 = vld [vmem:[%s471_s22 + $0x48] sm:$0xff]  ;;  %v125_v21 = vld [vmem:[%s471_s22 + $0x50] sm:$0xff]  ;;  %v126_v23 = vld [vmem:[%s471_s22 + $0x58] sm:$0xff] }
  0x21   : > { %v143_v24 = vld [vmem:[%s471_s22 + $0xe0] sm:$0xff]  ;;  %v144_v26 = vld [vmem:[%s471_s22 + $0xe8] sm:$0xff]  ;;  %v145_v28 = vld [vmem:[%s471_s22 + $0xf0] sm:$0xff] }
  0x22   : > { %181 = vxpose.xlu1.b32.cont [3/16] (narrow) %v133_v4, 8  ;;  %v127_v25 = vld [vmem:[%s471_s22 + $0x60] sm:$0xff]  ;;  %v128_v27 = vld [vmem:[%s471_s22 + $0x68] sm:$0xff]  ;;  %v129_v29 = vld [vmem:[%s471_s22 + $0x70] sm:$0xff] }
  0x23   : > { %149 = vxpose.xlu0.b32.cont [3/16] (narrow) %v117_v5, 8  ;;  %v146_v30 = vld [vmem:[%s471_s22 + $0xf8] sm:$0xff] }
  0x24   : > { %v130_v31 = vld [vmem:[%s471_s22 + $0x78] sm:$0xff] }
  0x26   : > { %182 = vxpose.xlu1.b32.cont [4/16] (narrow) %v134_v6, 8 }
  0x27   : > { %150 = vxpose.xlu0.b32.cont [4/16] (narrow) %v118_v7, 8 }
  0x2a   : > { %183 = vxpose.xlu1.b32.cont [5/16] (narrow) %v135_v8, 8 }
  0x2b   : > { %151 = vxpose.xlu0.b32.cont [5/16] (narrow) %v119_v9, 8 }
  0x2e   : > { %184 = vxpose.xlu1.b32.cont [6/16] (narrow) %v136_v10, 8 }
  0x2f   : > { %152 = vxpose.xlu0.b32.cont [6/16] (narrow) %v120_v11, 8 }
  0x32   : > { %185 = vxpose.xlu1.b32.cont [7/16] (narrow) %v137_v12, 8 }
  0x33   : > { %153 = vxpose.xlu0.b32.cont [7/16] (narrow) %v121_v13, 8 }
  0x36   : > { %186 = vxpose.xlu1.b32.cont [8/16] (narrow) %v138_v14, 8 }
  0x37   : > { %154 = vxpose.xlu0.b32.cont [8/16] (narrow) %v122_v15, 8 }
  0x3a   : > { %187 = vxpose.xlu1.b32.cont [9/16] (narrow) %v139_v16, 8 }
  0x3b   : > { %155 = vxpose.xlu0.b32.cont [9/16] (narrow) %v123_v17, 8 }
  0x3e   : > { %188 = vxpose.xlu1.b32.cont [10/16] (narrow) %v140_v18, 8 }
  0x3f   : > { %156 = vxpose.xlu0.b32.cont [10/16] (narrow) %v124_v19, 8 }
  0x42   : > { %189 = vxpose.xlu1.b32.cont [11/16] (narrow) %v141_v20, 8 }
  0x43   : > { %157 = vxpose.xlu0.b32.cont [11/16] (narrow) %v125_v21, 8 }
  0x46   : > { %190 = vxpose.xlu1.b32.cont [12/16] (narrow) %v142_v22, 8 }
  0x47   : > { %158 = vxpose.xlu0.b32.cont [12/16] (narrow) %v126_v23, 8 }
  0x4a   : > { %191 = vxpose.xlu1.b32.cont [13/16] (narrow) %v143_v24, 8 }
  0x4b   : > { %159 = vxpose.xlu0.b32.cont [13/16] (narrow) %v127_v25, 8 }
  0x4e   : > { %192 = vxpose.xlu1.b32.cont [14/16] (narrow) %v144_v26, 8 }
  0x4f   : > { %160 = vxpose.xlu0.b32.cont [14/16] (narrow) %v128_v27, 8 }
  0x52   : > { %193 = vxpose.xlu1.b32.cont [15/16] (narrow) %v145_v28, 8 }
  0x53   : > { %161 = vxpose.xlu0.b32.cont [15/16] (narrow) %v129_v29, 8 }
  0x56   : > { %194 = vxpose.xlu1.b32.end [16/16] (narrow) %v146_v30, 8 }
  0x57   : > { %162 = vxpose.xlu0.b32.end [16/16] (narrow) %v130_v31, 8 }
  0x9a   : > { %v195_v32 = vpop.trf.xlu1 }
  0x9b   : > { %v163_v33 = vpop.trf.xlu0 }
  0x9c   : > { %v213_v34 = vcombine.low %v163_v33, %v195_v32 }
  0x9e   : > { %215 = vst [vmem:[%s109_s26] sm:$0xff] %v213_v34 }
  0x9f   : > { %356 = shalt.err (!%p353_p3)
}
  0xa0   : > { %s357_s11 = scalar_lea.hbm %s510_s30, 128  ;;  %s361_s18 = scalar_lea.hbm %s553_s1, 256 }
  0xa1   : > { %p358_p4 = scmp.ne.s32.totalorder %s510_s30, %s357_s11  ;;  %p362_p9 = scmp.lt.u32.totalorder %s510_s30, %s553_s1 }
  0xa2   : > { %p363_p10 = scmp.lt.u32.totalorder %s361_s18, %s357_s11  ;;  %p365_p12 = scmp.lt.u32.totalorder %s357_s11, %s510_s30 }
  0xa3   : > { %p359_p7 = pnand %p358_p4, %p456_p5 }
  0xa4   : > { %p364_p11 = por %p363_p10, %p362_p9 }
  0xa5   : > { %p360_p8 = pneg %p359_p7 }
  0xa6   : > { %p366_p13 = por %p365_p12, %p364_p11 }
  0xa8   : > { %p367_p0 = pnand %p366_p13, %p360_p8 }
  0xaa   : > { %370 = shalt.err (!%p367_p0)
}
  0xab   : > { %304 = dma.vmem_to_hbm [thread:$0]  (%p456_p5), %s512_s27, 128, %s510_s30, %s217_s2  }
  0xac PF: > { %p310_p1 = scmp.ge.s32.totalorder %s405_s9, 2  ;;  %s243_s21 = sand.u32 1, %s393_s6  }
  0xad   : > { %s244_s22 = scalar_lea.sflag [#allocation3], %s243_s21 }
  0xae   : > { %p307_p2 = pnand %p310_p1, %p460_p6 }
  0xb0   : > { %388 = dma.done.wait (!%p307_p2), %s244_s22, 128  }
  0xb1   : > { %390 = vsyncadd (!%p307_p2), %s244_s22, 4294967168  ;;  %p11_p3 = scmp.ge.s32.totalorder %s443_s12, 4   ;;  %s556_s6 = smov %s397_s7 }
  0xb2   : > { %s557_s7 = smov %s401_s8  ;;  %s558_s8 = smov %s454_s15 }
  0xb3   : > { %s559_s9 = smov %s443_s12  ;;  %13 = sbr.rel (!%p11_p3) target bundleno = 3 (0x3), region = 59 }
  0xba   :  { %249 = vsyncpa [#allocation3], 1 }
  0xbb   :  { %251 = vsyncpa [#allocation3 + $0x1], 1 }

</bundles_post_ra>
